<compile_context>
chip_gen: v6e
topology: v6e:2x2x1
jax: 0.10.0
libtpu: 0.0.40
codegen_flags: <defaults>
</compile_context>

<pallas_src>
import math

import jax
import jax.numpy as jnp
from jax.experimental import pallas as pl
from jax.experimental.pallas import tpu as pltpu


def _round_up(v, m):
    return (v + m - 1) // m * m


def _sagpool_score_kernel(a_ref, zrel_ref, zroot_ref, xtile_ref, out_ref,
                          acc_ref):
    """Tiled neighbor aggregation + tanh + feature gating.

    grid = (row tiles [parallel], col tiles [arbitrary / reduction])

    a_ref     : (tm, tk) bf16  adjacency tile, A[i, j] = #edges j -> i
    zrel_ref  : (tk, 1)  f32   z_rel_j   = <x_j, w_rel>        (precomputed)
    zroot_ref : (tm, 1)  f32   z_root_i  = <x_i, w_root> + b   (precomputed)
    xtile_ref : (tm, Cp) f32   padded node features, column C is all-ones
    out_ref   : (tm, Cp) f32   cols [0:C): x * tanh(score), col C: tanh(score)
    acc_ref   : (tm, 1)  f32   running agg_i = sum_j A[i, j] * z_rel_j
    """
    k = pl.program_id(1)

    @pl.when(k == 0)
    def _():
        acc_ref[...] = jnp.zeros_like(acc_ref)

    # A values are exact small integers; upcast to f32 (VPU convert, hidden
    # under the A DMA) so z_rel stays in f32 — keeps top-k ordering stable.
    acc_ref[...] += jnp.dot(a_ref[...].astype(jnp.float32), zrel_ref[...],
                            preferred_element_type=jnp.float32)

    @pl.when(k == pl.num_programs(1) - 1)
    def _():
        s = jnp.tanh(acc_ref[...] + zroot_ref[...])            # (tm, 1)
        # Padded feature columns are 0 -> gated output stays 0 there, and the
        # ones column (index C) receives the raw score s: a single lane-dense
        # (tm, Cp) store, no narrow (N,1) write.
        out_ref[...] = xtile_ref[...] * s


def sagpool_score(a_bf16, z_rel_pad, z_root_pad, x_pad, *, tm, tk):
    """Run the fused scoring kernel.  Returns an (Np, Cp) f32 slab."""
    n_pad, cp = x_pad.shape
    assert n_pad % tm == 0 and n_pad % tk == 0

    # Per-step VMEM (double-buffered tiles; narrow blocks lane-pad to 128).
    vmem_bytes = (2 * tm * tk * 2          # bf16 A tiles
                  + 2 * tk * 128 * 4       # z_rel k-slices (lane-padded)
                  + 2 * tm * 128 * 4       # z_root row slices
                  + 2 * tm * cp * 4        # x row tile
                  + 2 * tm * cp * 4        # output tile
                  + tm * 128 * 4)          # accumulator scratch
    # Stay well under v7x's 64 MiB physical VMEM (v5e/v6e have 128 MiB, but
    # the tiled contraction keeps the requirement tiny regardless of N).
    vmem_limit = int(min(48 * 1024 * 1024,
                         max(4 * 1024 * 1024, 2 * vmem_bytes)))

    return pl.pallas_call(
        _sagpool_score_kernel,
        out_shape=jax.ShapeDtypeStruct((n_pad, cp), jnp.float32),
        grid=(n_pad // tm, n_pad // tk),
        in_specs=[
            pl.BlockSpec((tm, tk), lambda i, k: (i, k)),   # A tile (bf16)
            pl.BlockSpec((tk, 1), lambda i, k: (k, 0)),    # z_rel k-slice
            pl.BlockSpec((tm, 1), lambda i, k: (i, 0)),    # z_root row slice
            pl.BlockSpec((tm, cp), lambda i, k: (i, 0)),   # x row tile
        ],
        out_specs=pl.BlockSpec((tm, cp), lambda i, k: (i, 0)),
        scratch_shapes=[pltpu.VMEM((tm, 1), jnp.float32)],
        compiler_params=pltpu.CompilerParams(
            dimension_semantics=("parallel", "arbitrary"),
            vmem_limit_bytes=vmem_limit),
    )(a_bf16, z_rel_pad, z_root_pad, x_pad)


def sagpool_forward(x, edge_index, w_rel, w_root, bias,
                    ratio=0.5, multiplier=1.0, tile_rows=256, tile_cols=512):
    """Mirrors SAGPool4MAML.forward for a single graph (batch = zeros).

    Returns (x_pooled, new_edge_index, edge_mask, batch_pooled, perm,
             score_pooled).  new_edge_index keeps its static shape (2, E);
    dropped edges are marked with -1 and flagged in edge_mask.
    """
    n, c = x.shape
    src = edge_index[0]
    dst = edge_index[1]

    # Tiling geometry: tk (A lane dim) multiple of 128, tm (A sublane dim)
    # multiple of 16 (bf16 packing), both dividing n_pad (itself 128-aligned).
    n128 = _round_up(n, 128)
    tk = min(_round_up(int(tile_cols), 128), n128)
    tm = max(16, min(_round_up(int(tile_rows), 16), n128))
    if tk % tm != 0:
        tm = 128
        while tk % tm != 0:        # tk is a multiple of 128, so this is safe
            tm //= 2
    n_pad = _round_up(n, tk)
    cp = _round_up(c + 1, 128)

    x32 = x.astype(jnp.float32)
    w_rel32 = jnp.asarray(w_rel, jnp.float32).reshape(c, 1)
    w_root32 = jnp.asarray(w_root, jnp.float32).reshape(c, 1)
    bias_scalar = jnp.asarray(bias, jnp.float32).reshape(())

    # Hoisted projections (done once, O(N*C)); kept in f32.
    z_rel = x32 @ w_rel32                        # (n, 1)
    z_root = x32 @ w_root32 + bias_scalar        # (n, 1)  (GraphConv bias folded)
    z_rel_pad = jnp.zeros((n_pad, 1), jnp.float32).at[:n].set(z_rel)
    z_root_pad = jnp.zeros((n_pad, 1), jnp.float32).at[:n].set(z_root)

    # Padded feature slab with a constant ones column at index c (it receives
    # the raw score in the kernel output -> single lane-dense store).
    x_pad = jnp.zeros((n_pad, cp), jnp.float32)
    x_pad = x_pad.at[:n, :c].set(x32)
    x_pad = x_pad.at[:, c].set(1.0)

    # Dense adjacency built directly in the streamed dtype (bf16 is exact for
    # edge multiplicities <= 256).  A[dst, src] = edge count.
    # TODO(synk): replace the dense N x N adjacency with an O(E) edge-list
    # segment-sum of z_rel for large graphs, and use an int8 A on v5e/v6e.
    a_bf16 = (jnp.zeros((n_pad, n_pad), jnp.bfloat16)
              .at[dst, src].add(jnp.ones((), jnp.bfloat16)))

    # TODO(synk): for the MAML many-tiny-graphs use case, batch graphs on a
    # leading grid axis of a single pallas_call (and pack several C=32 feature
    # blocks into one 128-lane group) instead of one call + glue per graph.
    slab = sagpool_score(a_bf16, z_rel_pad, z_root_pad, x_pad, tm=tm, tk=tk)

    score_full = slab[:, c]                      # (Np,)  tanh(GNN(x, A))
    gated_full = slab[:, :c]                     # (Np, C) x * tanh(score)

    # topk(score, ratio, batch): k = ceil(ratio * N) highest-scoring nodes;
    # padded rows are masked out before selection.
    node_ids = jnp.arange(n_pad, dtype=jnp.int32)
    score_masked = jnp.where(node_ids < n, score_full, -jnp.inf)
    k_keep = int(math.ceil(ratio * n))
    _, perm = jax.lax.top_k(score_masked, k_keep)
    perm = perm.astype(jnp.int32)

    x_pooled = gated_full[perm]
    if multiplier != 1.0:
        x_pooled = multiplier * x_pooled

    batch = jnp.zeros((n,), jnp.int32)
    batch_pooled = batch[perm]

    # filter_adj: keep only edges whose endpoints are both kept, reindex them.
    node_map = jnp.full((n,), -1, jnp.int32).at[perm].set(
        jnp.arange(k_keep, dtype=jnp.int32))
    new_src = node_map[src]
    new_dst = node_map[dst]
    edge_mask = (new_src >= 0) & (new_dst >= 0)
    new_edge_index = jnp.where(edge_mask[None, :],
                               jnp.stack([new_src, new_dst]),
                               jnp.int32(-1))
    # TODO(synk): PyG's filter_adj compacts the edge list to dynamic length E';
    # with static shapes we return the padded (2, E) array plus edge_mask.

    return (x_pooled, new_edge_index, edge_mask, batch_pooled, perm,
            score_full[perm])


if __name__ == "__main__":
    key = jax.random.PRNGKey(0)
    k_x, k_e, k_wr, k_wo = jax.random.split(key, 4)

    # Small shapes: N=256 nodes, C=32 in_channels, E=768 directed edges.
    # tile_cols=128 gives a 2-step reduction grid (exercises the accumulator).
    N, C, E = 256, 32, 768
    ratio = 0.5

    x = jax.random.normal(k_x, (N, C), dtype=jnp.float32)
    edge_index = jax.random.randint(k_e, (2, E), 0, N, dtype=jnp.int32)

    # GraphConv(in_channels=C, out_channels=1) parameters:
    # lin_rel: weight (C,1) + bias, lin_root: weight (C,1), no bias.
    glorot = 1.0 / jnp.sqrt(jnp.float32(C))
    w_rel = jax.random.uniform(k_wr, (C, 1), jnp.float32, -1.0, 1.0) * glorot
    w_root = jax.random.uniform(k_wo, (C, 1), jnp.float32, -1.0, 1.0) * glorot
    bias = jnp.full((1, 1), 0.1, jnp.float32)

    outs = sagpool_forward(x, edge_index, w_rel, w_root, bias,
                           ratio=ratio, multiplier=1.0,
                           tile_rows=64, tile_cols=128)
    outs = jax.block_until_ready(outs)

    x_pooled, new_edge_index, edge_mask, batch_pooled, perm, score_pooled = outs
    k_keep = int(math.ceil(ratio * N))
    assert x_pooled.shape == (k_keep, C)
    assert new_edge_index.shape == (2, E)
    assert perm.shape == (k_keep,)

    # Pure-JAX f32 reference.
    a_ref = jnp.zeros((N, N), jnp.float32).at[edge_index[1], edge_index[0]].add(1.0)
    s_ref = jnp.tanh(a_ref @ (x @ w_rel) + x @ w_root + bias[0, 0])   # (N, 1)
    gated_ref = x * s_ref
    assert jnp.allclose(score_pooled, s_ref[perm, 0], atol=5e-2, rtol=5e-2)
    assert jnp.allclose(x_pooled, gated_ref[perm], atol=5e-2, rtol=5e-2)

    print("KERNEL_OK")
</pallas_src>

<mosaic_0001>
module attributes {stable_mosaic.version = 11 : i64} {
  func.func @_sagpool_score_kernel(%arg0: i32, %arg1: i32, %arg2: memref<64x128xbf16, #tpu.memory_space<vmem>>, %arg3: memref<128x1xf32, #tpu.memory_space<vmem>>, %arg4: memref<64x1xf32, #tpu.memory_space<vmem>>, %arg5: memref<64x128xf32, #tpu.memory_space<vmem>>, %arg6: memref<64x128xf32, #tpu.memory_space<vmem>>, %arg7: memref<64x1xf32, #tpu.memory_space<vmem>>) attributes {dimension_semantics = [#tpu.dimension_semantics<parallel>, #tpu.dimension_semantics<arbitrary>], iteration_bounds = array<i64: 4, 2>, scalar_prefetch = 0 : i64, scratch_operands = 1 : i64, tpu.core_type = #tpu.core_type<tc>, window_params = [{transform_indices = @transform_0, window_bounds = array<i64: 64, 128>}, {transform_indices = @transform_1, window_bounds = array<i64: 128, 1>}, {transform_indices = @transform_2, window_bounds = array<i64: 64, 1>}, {transform_indices = @transform_3, window_bounds = array<i64: 64, 128>}, {transform_indices = @transform_4, window_bounds = array<i64: 64, 128>}]} {
    %c0_i32 = arith.constant 0 : i32
    %0 = arith.cmpi eq, %arg1, %c0_i32 : i32
    %1 = arith.extui %0 : i1 to i32
    %c0_i32_0 = arith.constant 0 : i32
    %2 = arith.cmpi ne, %1, %c0_i32_0 : i32
    scf.if %2 {
      %cst_9 = arith.constant 0.000000e+00 : f32
      %13 = vector.broadcast %cst_9 : f32 to vector<64x1xf32>
      %c0_10 = arith.constant 0 : index
      %c0_11 = arith.constant 0 : index
      %14 = vector.load %arg7[%c0_10, %c0_11] : memref<64x1xf32, #tpu.memory_space<vmem>>, vector<64x1xf32>
      tpu.vector_store %arg7[%c0_10, %c0_11], %13 {strides = array<i32>} : memref<64x1xf32, #tpu.memory_space<vmem>>, vector<64x1xf32>,
    } else {
    }
    %c0 = arith.constant 0 : index
    %c0_1 = arith.constant 0 : index
    %3 = vector.load %arg7[%c0, %c0_1] : memref<64x1xf32, #tpu.memory_space<vmem>>, vector<64x1xf32>
    %c0_2 = arith.constant 0 : index
    %c0_3 = arith.constant 0 : index
    %4 = vector.load %arg2[%c0_2, %c0_3] : memref<64x128xbf16, #tpu.memory_space<vmem>>, vector<64x128xbf16>
    %5 = arith.extf %4 : vector<64x128xbf16> to vector<64x128xf32>
    %c0_4 = arith.constant 0 : index
    %c0_5 = arith.constant 0 : index
    %6 = vector.load %arg3[%c0_4, %c0_5] : memref<128x1xf32, #tpu.memory_space<vmem>>, vector<128x1xf32>
    %cst = arith.constant dense<0.000000e+00> : vector<64x1xf32>
    %7 = tpu.matmul %5, %6, %cst {dimension_numbers = #tpu.dot_dimension_numbers<[1], [0], [0], [1], [0, 0, 1, 1], [], []>} : vector<64x128xf32>, vector<128x1xf32>, vector<64x1xf32> -> vector<64x1xf32>
    %8 = arith.addf %3, %7 : vector<64x1xf32>
    %c0_6 = arith.constant 0 : index
    %c0_7 = arith.constant 0 : index
    %9 = vector.load %arg7[%c0_6, %c0_7] : memref<64x1xf32, #tpu.memory_space<vmem>>, vector<64x1xf32>
    tpu.vector_store %arg7[%c0_6, %c0_7], %8 {strides = array<i32>} : memref<64x1xf32, #tpu.memory_space<vmem>>, vector<64x1xf32>,
    %c1_i32 = arith.constant 1 : i32
    %10 = arith.cmpi eq, %arg1, %c1_i32 : i32
    %11 = arith.extui %10 : i1 to i32
    %c0_i32_8 = arith.constant 0 : i32
    %12 = arith.cmpi ne, %11, %c0_i32_8 : i32
    scf.if %12 {
      %c0_9 = arith.constant 0 : index
      %c0_10 = arith.constant 0 : index
      %13 = vector.load %arg7[%c0_9, %c0_10] : memref<64x1xf32, #tpu.memory_space<vmem>>, vector<64x1xf32>
      %c0_11 = arith.constant 0 : index
      %c0_12 = arith.constant 0 : index
      %14 = vector.load %arg4[%c0_11, %c0_12] : memref<64x1xf32, #tpu.memory_space<vmem>>, vector<64x1xf32>
      %15 = arith.addf %13, %14 : vector<64x1xf32>
      %16 = math.tanh %15 : vector<64x1xf32>
      %c0_13 = arith.constant 0 : index
      %c0_14 = arith.constant 0 : index
      %17 = vector.load %arg5[%c0_13, %c0_14] : memref<64x128xf32, #tpu.memory_space<vmem>>, vector<64x128xf32>
      %18 = vector.broadcast %16 : vector<64x1xf32> to vector<64x128xf32>
      %19 = arith.mulf %17, %18 : vector<64x128xf32>
      %c0_15 = arith.constant 0 : index
      %c0_16 = arith.constant 0 : index
      %20 = vector.load %arg6[%c0_15, %c0_16] : memref<64x128xf32, #tpu.memory_space<vmem>>, vector<64x128xf32>
      tpu.vector_store %arg6[%c0_15, %c0_16], %19 {strides = array<i32>} : memref<64x128xf32, #tpu.memory_space<vmem>>, vector<64x128xf32>,
    } else {
    }
    return
  }
  func.func @transform_0(%arg0: i32, %arg1: i32) -> (i32, i32) {
    %c0_i32 = arith.constant 0 : i32
    return %arg0, %arg1 : i32, i32
  }
  func.func @transform_1(%arg0: i32, %arg1: i32) -> (i32, i32) {
    %c0_i32 = arith.constant 0 : i32
    %c0_i32_0 = arith.constant 0 : i32
    return %arg1, %c0_i32 : i32, i32
  }
  func.func @transform_2(%arg0: i32, %arg1: i32) -> (i32, i32) {
    %c0_i32 = arith.constant 0 : i32
    %c0_i32_0 = arith.constant 0 : i32
    return %arg0, %c0_i32 : i32, i32
  }
  func.func @transform_3(%arg0: i32, %arg1: i32) -> (i32, i32) {
    %c0_i32 = arith.constant 0 : i32
    %c0_i32_0 = arith.constant 0 : i32
    return %arg0, %c0_i32 : i32, i32
  }
  func.func @transform_4(%arg0: i32, %arg1: i32) -> (i32, i32) {
    %c0_i32 = arith.constant 0 : i32
    %c0_i32_0 = arith.constant 0 : i32
    return %arg0, %c0_i32 : i32, i32
  }
}

</mosaic_0001>

<bundles_post_ra>
// kernel: tpu_custom_call.1
= control target key start
LH: loop header
LB: loop body
LE: loop exit
PB: predicated region body
PF: predicated region fallthrough
CT: control target
= control target key end

     0   :  { %s1400_s0 = inlined_call_operand.vmem [shape: bf16[256,256], index: 0, kind: input, shape index: {}]   ;;  %s1401_s1 = inlined_call_operand.vmem [shape: f32[256,1], index: 1, kind: input, shape index: {}]   ;;  %s1402_s2 = inlined_call_operand.vmem [shape: f32[256,1], index: 2, kind: input, shape index: {}]   ;;  %s1403_s3 = inlined_call_operand.vmem [shape: f32[256,128], index: 3, kind: input, shape index: {}]   ;;  %s1404_s4 = inlined_call_operand.hbm [shape: f32[256,128], index: 4, kind: output, shape index: {}]  }
   0x1   :  { %1410 = sst [smem:[#allocation12_spill]] %s1400_s0 }
   0x2   :  { %9 = vsyncpa [#allocation5], 0 }
   0x3   :  { %11 = vsyncpa [#allocation5 + $0x1], 0  ;;  %s1152_s15 = smov 0   ;;  %s1154_s16 = smov 0  }
   0x4   :  { %s1156_s17 = smov 0   ;;  %s1158_s18 = smov 0  }
   0x5   :  { %s1160_s19 = smov 0   ;;  %s1162_s20 = smov 0  }
   0x6   :  { %s1164_s21 = smov 0   ;;  %s1166_s22 = smov 0  }
   0x7   :  { %s1168_s23 = smov 0   ;;  %s1170_s24 = smov 0  }
   0x8 LB: > { %1411 = sst [smem:[#allocation7_spill]] %s1112_s22  ;;  %s758_s25 = sadd.s32 4294967295, %s1120_s24   ;;  %s1120_s24 = sphi %s1170_s24, %s17_s24   ;;  %s1116_s23 = sphi %s1168_s23, %s1425_s23   ;;  %s1112_s22 = sphi %s1166_s22, %s1424_s22   ;;  %s1108_s21 = sphi %s1164_s21, %s1423_s21   ;;  %s1104_s20 = sphi %s1162_s20, %s1422_s20   ;;  %s1100_s19 = sphi %s1160_s19, %s1430_s19   ;;  %s1096_s18 = sphi %s1158_s18, %s1429_s18   ;;  %s1092_s17 = sphi %s1156_s17, %s1428_s17   ;;  %s1088_s16 = sphi %s1154_s16, %s1427_s16   ;;  %s1084_s15 = sphi %s1152_s15, %s1426_s15  }
   0x9   : > { %1412 = sst [smem:[#allocation8_spill]] %s1116_s23  ;;  %s759_s26 = sadd.s32 4294967294, %s1120_s24  }
   0xa   : > { %s26_s27 = sadd.s32 1, %s1112_s22  ;;  %s29_s28 = sadd.s32 1, %s1116_s23 }
   0xb   : > { %p27_p0 = scmp.ge.s32.totalorder %s26_s27, 2  ;;  %s38_s29 = sadd.s32 1, %s1100_s19 }
   0xc   : > { %p45_p1 = scmp.ne.s32.totalorder %s1100_s19, %s1096_s18  ;;  %p46_p2 = scmp.eq.s32.totalorder %s1120_s24, 0 }
   0xd   : > { %s1432_s27 = smov (%p27_p0, %s26_s27), 0  ;;  %s1434_s28 = smov (!%p27_p0, %s29_s28), %s1116_s23 }
   0xe   : > { %1413 = sst [smem:[#allocation9_spill]] %s1432_s27  ;;  %s34_s30 = ssub.s32 %s1112_s22, %s1432_s27 }
   0xf   : > { %p1215_p3 = por %p46_p2, %p45_p1  ;;  %p31_p4 = scmp.ge.s32.totalorder %s1434_s28, 4 }
  0x10   : > { %s142_s6 = sadd.s32 1, %s1092_s17  ;;  %p152_p5 = scmp.ne.s32.totalorder %s1092_s17, %s1088_s16 }
  0x11   : > { %p153_p6 = scmp.eq.s32.totalorder %s758_s25, 7  ;;  %s1436_s28 = smov (%p31_p4, %s1434_s28), 0 }
  0x12   : > { %1415 = sst [smem:[#allocation10_spill]] %s1436_s28  ;;  %p158_p8 = scmp.ne.s32.totalorder %s1088_s16, %s1084_s15 }
  0x13   : > { %p1224_p7 = por %p153_p6, %p152_p5  ;;  %s33_s8 = ssub.s32 %s1116_s23, %s1436_s28 }
  0x14   : > { %p159_p9 = scmp.eq.s32.totalorder %s759_s26, 7  ;;  %s35_s9 = sor.u32 %s34_s30, %s33_s8 }
  0x15   : > { %p140_p10 = scmp.eq.s32.totalorder %s33_s8, 0  ;;  %p36_p11 = scmp.eq.s32.totalorder %s35_s9, 0 }
  0x16   : > { %p1232_p12 = por %p159_p9, %p158_p8  ;;  %p761_p13 = scmp.ge.s32.totalorder %s1120_s24, 8 }
  0x17   : > { %s1237_s11 = scalar_select %p140_p10, %s1092_s17, %s142_s6  }
  0x18   : > { %s1240_s12 = scalar_select %p36_p11, %s1100_s19, %s38_s29  }
  0x19   : > { %175 = sbr.rel (%p761_p13) target bundleno = 45 (0x2d), region = 16 }
  0x1a   : > { %1418 = sst [smem:[#allocation11_spill]] %s1240_s12 }
  0x1e   : > { %178 = sbr.rel (!%p1215_p3) target bundleno = 45 (0x2d), region = 20  ;;  %s180_s13 = sand.u32 (%p1215_p3), 1, %s1100_s19  }
  0x1f   : > { %s782_s14 = sshll.u32 (%p1215_p3), %s1116_s23, 4  ;;  %s762_s25 = sshll.u32 (%p1215_p3), %s180_s13, 5 }
  0x20   : > { %s185_s26 = sadd.s32 (%p1215_p3), %s1112_s22, %s782_s14  ;;  %s1419_s0 = sld [smem:[#allocation12_spill]] (%p1215_p3) }
  0x21   : > { %s765_s30 = sshll.u32 (%p1215_p3), %s185_s26, 2  ;;  %s182_s29 = scalar_lea.vmem (%p1215_p3), [#allocation3], %s762_s25 }
  0x26   : > { %s187_s6 = scalar_lea.vmem %s1419_s0, %s765_s30 }
  0x27   : > { %v204_v0 = vld [vmem:[%s187_s6] sm:$0xf]  ;;  %v206_v1 = vld [vmem:[%s187_s6 + $0x8] sm:$0xf]  ;;  %v208_v2 = vld [vmem:[%s187_s6 + $0x10] sm:$0xf] }
  0x28   : > { %205 = vst [vmem:[%s182_s29] sm:$0xf] %v204_v0  ;;  %207 = vst [vmem:[%s182_s29 + $0x4] sm:$0xf] %v206_v1  ;;  %v210_v3 = vld [vmem:[%s187_s6 + $0x18] sm:$0xf] }
  0x29   : > { %209 = vst [vmem:[%s182_s29 + $0x8] sm:$0xf] %v208_v2  ;;  %v212_v4 = vld [vmem:[%s187_s6 + $0x20] sm:$0xf]  ;;  %v214_v5 = vld [vmem:[%s187_s6 + $0x28] sm:$0xf] }
  0x2a   : > { %211 = vst [vmem:[%s182_s29 + $0xc] sm:$0xf] %v210_v3  ;;  %213 = vst [vmem:[%s182_s29 + $0x10] sm:$0xf] %v212_v4  ;;  %v216_v6 = vld [vmem:[%s187_s6 + $0x30] sm:$0xf] }
  0x2b   : > { %215 = vst [vmem:[%s182_s29 + $0x14] sm:$0xf] %v214_v5  ;;  %v218_v7 = vld [vmem:[%s187_s6 + $0x38] sm:$0xf]  ;;  %217 = vst [vmem:[%s182_s29 + $0x18] sm:$0xf] %v216_v6 }
  0x2c   : > { %219 = vst [vmem:[%s182_s29 + $0x1c] sm:$0xf] %v218_v7 }
  0x2d PF: > { %p766_p0 = scmp.ge.s32.totalorder %s1120_s24, 1  ;;  %p285_p1 = scmp.lt.s32.totalorder %s1120_s24, 9 }
  0x2f   : > { %p286_p2 = pnand %p766_p0, %p285_p1 }
  0x30   : > { %s292_s5 = sand.u32 (!%p286_p2), 1, %s1096_s18   ;;  %s1407_s13 = sand.u32 (!%p286_p2), 1, %s1088_s16  }
  0x31   : > { %289 = sbr.rel (%p286_p2) target bundleno = 491 (0x1eb), region = 73  ;;  %s767_s14 = sshll.u32 (!%p286_p2), %s292_s5, 5 }
  0x32   : > { %s768_s25 = sshll.u32 (!%p286_p2), %s1407_s13, 6  ;;  %s769_s26 = sshll.u32 (!%p286_p2), %s1104_s20, 4 }
  0x33   : > { %s771_s30 = sshll.u32 (!%p286_p2), %s1108_s21, 3  ;;  %p334_p3 = scmp.lt.s32.totalorder (!%p286_p2), %s769_s26, 31 }
  0x34   : > { %p340_p4 = scmp.lt.s32.totalorder (!%p286_p2), %s771_s30, 31  ;;  %s1274_s22 = scalar_lea.vmem (!%p286_p2), [#allocation3], %s767_s14 }
  0x35   : > { %s1276_s12 = scalar_lea.vmem (!%p286_p2), [#allocation4], %s768_s25  ;;  %p775_p5 = scmp.ne.s32.totalorder (!%p286_p2), %s1104_s20, 0 }
  0x36   : > { %s1438_s26 = smov (!%p334_p3, %s769_s26), 31  ;;  %s1440_s30 = smov (!%p340_p4, %s771_s30), 31 }
  0x37   : > { %s770_s8 = sshll.u32 %s1438_s26, 3  ;;  %s772_s0 = sshll.u32 %s1440_s30, 3 }
  0x38   : > { %s1262_s29 = scalar_lea.vmem %s1401_s1, %s770_s8  ;;  %s1267_s18 = scalar_lea.vmem %s1402_s2, %s772_s0 }
  0x39   : > { %s1272_s23 = scalar_lea.vmem %s1403_s3, %s772_s0  ;;  %355 = sbr.rel (%p775_p5) target bundleno = 67 (0x43), region = 81 }
  0x3e   : > { %vm356_vm0 = vcmask 7168   ;;  %v1122_v8 = vmov 0.0  }
  0x3f   : > { %357 = vst.msk [vmem:[#allocation2] sm:$0xff] %vm356_vm0, %v1122_v8  ;;  %358 = vst.msk [vmem:[#allocation2 + $0x8] sm:$0xff] %vm356_vm0, %v1122_v8 }
  0x40   : > { %359 = vst.msk [vmem:[#allocation2 + $0x10] sm:$0xff] %vm356_vm0, %v1122_v8  ;;  %360 = vst.msk [vmem:[#allocation2 + $0x18] sm:$0xff] %vm356_vm0, %v1122_v8 }
  0x41   : > { %361 = vst.msk [vmem:[#allocation2 + $0x20] sm:$0xff] %vm356_vm0, %v1122_v8  ;;  %362 = vst.msk [vmem:[#allocation2 + $0x28] sm:$0xff] %vm356_vm0, %v1122_v8 }
  0x42   : > { %363 = vst.msk [vmem:[#allocation2 + $0x30] sm:$0xff] %vm356_vm0, %v1122_v8  ;;  %364 = vst.msk [vmem:[#allocation2 + $0x38] sm:$0xff] %vm356_vm0, %v1122_v8 }
  0x43 PF: > { %v404_v9 = vld [vmem:[%s1262_s29 + $0x78] sm:$0xff]  ;;  %v403_v10 = vld [vmem:[%s1262_s29 + $0x70] sm:$0xff]  ;;  %v402_v11 = vld [vmem:[%s1262_s29 + $0x68] sm:$0xff]  ;;  %vm518_vm1 = vcmask 7168   ;;  %p776_p6 = scmp.ne.s32.totalorder %s1104_s20, 1 }
  0x44   : > { %827 = vmatprep.subr.mxu0 %v404_v9  ;;  %871 = vmatprep.subr.mxu1 %v404_v9  ;;  %v401_v12 = vld [vmem:[%s1262_s29 + $0x60] sm:$0xff]  ;;  %v400_v13 = vld [vmem:[%s1262_s29 + $0x58] sm:$0xff]  ;;  %v399_v14 = vld [vmem:[%s1262_s29 + $0x50] sm:$0xff] }
  0x45   : > { %828 = vmatpush3.msra.mxu0 %v404_v9  ;;  %887 = vmatpush3.msra.mxu1 %v404_v9  ;;  %v398_v15 = vld [vmem:[%s1262_s29 + $0x48] sm:$0xff]  ;;  %v397_v16 = vld [vmem:[%s1262_s29 + $0x40] sm:$0xff]  ;;  %v396_v17 = vld [vmem:[%s1262_s29 + $0x38] sm:$0xff] }
  0x46   : > { %829 = vmatprep.subr.mxu0 %v403_v10  ;;  %872 = vmatprep.subr.mxu1 %v403_v10  ;;  %v395_v18 = vld [vmem:[%s1262_s29 + $0x30] sm:$0xff]  ;;  %v394_v19 = vld [vmem:[%s1262_s29 + $0x28] sm:$0xff]  ;;  %v393_v20 = vld [vmem:[%s1262_s29 + $0x20] sm:$0xff] }
  0x47   : > { %830 = vmatpush3.msra.mxu0 %v403_v10  ;;  %888 = vmatpush3.msra.mxu1 %v403_v10  ;;  %v392_v21 = vld [vmem:[%s1262_s29 + $0x18] sm:$0xff]  ;;  %v391_v22 = vld [vmem:[%s1262_s29 + $0x10] sm:$0xff]  ;;  %v390_v23 = vld [vmem:[%s1262_s29 + $0x8] sm:$0xff] }
  0x48   : > { %831 = vmatprep.subr.mxu0 %v402_v11  ;;  %873 = vmatprep.subr.mxu1 %v402_v11  ;;  %v785_v24 = vld [vmem:[%s1274_s22] sm:$0xff]   ;;  %v801_v25 = vld [vmem:[%s1274_s22 + $0x10] sm:$0xff]   ;;  %v800_v27 = vld [vmem:[%s1274_s22 + $0x8] sm:$0xff]  }
  0x49   : > { %832 = vmatpush3.msra.mxu0 %v402_v11  ;;  %889 = vmatpush3.msra.mxu1 %v402_v11  ;;  %v389_v26 = vld [vmem:[%s1262_s29] sm:$0xff]  ;;  %v802_v28 = vld [vmem:[%s1274_s22 + $0x18] sm:$0xff]   ;;  %v786_v29 = vunpack.c.l.bf16 %v785_v24  ;;  %v794_v30 = vunpack.c.l.bf16 %v801_v25  ;;  %v787_v31 = vunpack.c.h.bf16 %v785_v24  ;;  %v795_v32 = vunpack.c.h.bf16 %v801_v25  ;;  %v366_v37 = vld [vmem:[#allocation2 + $0x8] sm:$0xff] }
  0x4a   : > { %833 = vmatprep.subr.mxu0 %v401_v12  ;;  %874 = vmatprep.subr.mxu1 %v401_v12  ;;  %v790_v33 = vunpack.c.l.bf16 %v800_v27  ;;  %v798_v34 = vunpack.c.l.bf16 %v802_v28  ;;  %v791_v35 = vunpack.c.h.bf16 %v800_v27  ;;  %v799_v36 = vunpack.c.h.bf16 %v802_v28  ;;  %v370_v38 = vld [vmem:[#allocation2 + $0x28] sm:$0xff]  ;;  %v365_v41 = vld [vmem:[#allocation2] sm:$0xff]  ;;  %v368_v47 = vld [vmem:[#allocation2 + $0x18] sm:$0xff] }
  0x4b   : > { %834 = vmatpush3.msra.mxu0 %v401_v12  ;;  %890 = vmatpush3.msra.mxu1 %v401_v12  ;;  %v369_v42 = vld [vmem:[#allocation2 + $0x20] sm:$0xff]  ;;  %v372_v48 = vld [vmem:[#allocation2 + $0x38] sm:$0xff]  ;;  %v367_v53 = vld [vmem:[#allocation2 + $0x10] sm:$0xff] }
  0x4c   : > { %835 = vmatprep.subr.mxu0 %v400_v13  ;;  %875 = vmatprep.subr.mxu1 %v400_v13  ;;  %v371_v54 = vld [vmem:[#allocation2 + $0x30] sm:$0xff] }
  0x4d   : > { %836 = vmatpush3.msra.mxu0 %v400_v13  ;;  %891 = vmatpush3.msra.mxu1 %v400_v13 }
  0x4e   : > { %837 = vmatprep.subr.mxu0 %v399_v14  ;;  %876 = vmatprep.subr.mxu1 %v399_v14 }
  0x4f   : > { %838 = vmatpush3.msra.mxu0 %v399_v14  ;;  %892 = vmatpush3.msra.mxu1 %v399_v14 }
  0x50   : > { %839 = vmatprep.subr.mxu0 %v398_v15  ;;  %877 = vmatprep.subr.mxu1 %v398_v15 }
  0x51   : > { %840 = vmatpush3.msra.mxu0 %v398_v15  ;;  %893 = vmatpush3.msra.mxu1 %v398_v15 }
  0x52   : > { %841 = vmatprep.subr.mxu0 %v397_v16  ;;  %878 = vmatprep.subr.mxu1 %v397_v16 }
  0x53   : > { %842 = vmatpush3.msra.mxu0 %v397_v16  ;;  %894 = vmatpush3.msra.mxu1 %v397_v16 }
  0x54   : > { %843 = vmatprep.subr.mxu0 %v396_v17  ;;  %879 = vmatprep.subr.mxu1 %v396_v17 }
  0x55   : > { %844 = vmatpush3.msra.mxu0 %v396_v17  ;;  %895 = vmatpush3.msra.mxu1 %v396_v17 }
  0x56   : > { %845 = vmatprep.subr.mxu0 %v395_v18  ;;  %880 = vmatprep.subr.mxu1 %v395_v18 }
  0x57   : > { %846 = vmatpush3.msra.mxu0 %v395_v18  ;;  %896 = vmatpush3.msra.mxu1 %v395_v18 }
  0x58   : > { %847 = vmatprep.subr.mxu0 %v394_v19  ;;  %881 = vmatprep.subr.mxu1 %v394_v19 }
  0x59   : > { %848 = vmatpush3.msra.mxu0 %v394_v19  ;;  %897 = vmatpush3.msra.mxu1 %v394_v19 }
  0x5a   : > { %849 = vmatprep.subr.mxu0 %v393_v20  ;;  %882 = vmatprep.subr.mxu1 %v393_v20 }
  0x5b   : > { %850 = vmatpush3.msra.mxu0 %v393_v20  ;;  %898 = vmatpush3.msra.mxu1 %v393_v20 }
  0x5c   : > { %851 = vmatprep.subr.mxu0 %v392_v21  ;;  %883 = vmatprep.subr.mxu1 %v392_v21 }
  0x5d   : > { %852 = vmatpush3.msra.mxu0 %v392_v21  ;;  %899 = vmatpush3.msra.mxu1 %v392_v21 }
  0x5e   : > { %853 = vmatprep.subr.mxu0 %v391_v22  ;;  %884 = vmatprep.subr.mxu1 %v391_v22 }
  0x5f   : > { %854 = vmatpush3.msra.mxu0 %v391_v22  ;;  %900 = vmatpush3.msra.mxu1 %v391_v22 }
  0x60   : > { %855 = vmatprep.subr.mxu0 %v390_v23  ;;  %885 = vmatprep.subr.mxu1 %v390_v23 }
  0x61   : > { %856 = vmatpush3.msra.mxu0 %v390_v23  ;;  %901 = vmatpush3.msra.mxu1 %v390_v23 }
  0x62   : > { %857 = vmatprep.subr.mxu0 %v389_v26  ;;  %886 = vmatprep.subr.mxu1 %v389_v26 }
  0x63   : > { %858 = vmatpush3.msra.mxu0 %v389_v26  ;;  %902 = vmatpush3.msra.mxu1 %v389_v26 }
  0x64   : > { %859 = vmatprep.mubr.f32.mxu0 %v786_v29  ;;  %865 = vmatprep.mubr.f32.mxu1 %v794_v30 }
  0x65   : > { %860 = vmatmul.mubr.f32.vlgmr.msra.gmra.mxu0 %v787_v31  ;;  %866 = vmatmul.mubr.f32.vlgmr.msra.gmra.mxu1 %v795_v32 }
  0x66   : > { %862 = vmatprep.mubr.f32.mxu0 %v790_v33  ;;  %868 = vmatprep.mubr.f32.mxu1 %v798_v34 }
  0x69   : > { %863 = vmatmul.mubr.f32.gmra.mxu0 %v791_v35  ;;  %869 = vmatmul.mubr.f32.gmra.mxu1 %v799_v36 }
 0x125   : > { %v861_v39 = vpop.f32.mrf.mxu0  ;;  %v867_v40 = vpop.f32.mrf.mxu1 }
 0x126   : > { %v511_v43 = vadd.f32 %v861_v39, %v366_v37  ;;  %v515_v44 = vadd.f32 %v867_v40, %v370_v38 }
 0x127   : > { %v471_v45 = vpop.f32.mrf.mxu0  ;;  %v491_v46 = vpop.f32.mrf.mxu1 }
 0x128   : > { %520 = vst.msk [vmem:[#allocation2 + $0x8] sm:$0xff] %vm518_vm1, %v511_v43  ;;  %524 = vst.msk [vmem:[#allocation2 + $0x28] sm:$0xff] %vm518_vm1, %v515_v44  ;;  %v510_v49 = vadd.f32 %v471_v45, %v365_v41  ;;  %v514_v50 = vadd.f32 %v491_v46, %v369_v42 }
 0x129   : > { %v864_v51 = vpop.f32.mrf.mxu0  ;;  %v870_v52 = vpop.f32.mrf.mxu1 }
 0x12a   : > { %519 = vst.msk [vmem:[#allocation2] sm:$0xff] %vm518_vm1, %v510_v49  ;;  %523 = vst.msk [vmem:[#allocation2 + $0x20] sm:$0xff] %vm518_vm1, %v514_v50  ;;  %v513_v55 = vadd.f32 %v864_v51, %v368_v47  ;;  %v517_v56 = vadd.f32 %v870_v52, %v372_v48  ;;  %530 = sbr.rel (%p776_p6) target bundleno = 466 (0x1d2), region = 85 }
 0x12b   : > { %v481_v57 = vpop.f32.mrf.mxu0  ;;  %v501_v58 = vpop.f32.mrf.mxu1 }
 0x12c   : > { %522 = vst.msk [vmem:[#allocation2 + $0x18] sm:$0xff] %vm518_vm1, %v513_v55  ;;  %526 = vst.msk [vmem:[#allocation2 + $0x38] sm:$0xff] %vm518_vm1, %v517_v56  ;;  %v512_v59 = vadd.f32 %v481_v57, %v367_v53  ;;  %v516_v60 = vadd.f32 %v501_v58, %v371_v54 }
 0x12e   : > { %521 = vst.msk [vmem:[#allocation2 + $0x10] sm:$0xff] %vm518_vm1, %v512_v59  ;;  %525 = vst.msk [vmem:[#allocation2 + $0x30] sm:$0xff] %vm518_vm1, %v516_v60 }
 0x12f   : > { %v541_v62 = vld [vmem:[%s1267_s18 + $0x10] sm:$0xff]  ;;  %v1123_v0 = vmov 0   ;;  %v539_v2 = vld [vmem:[%s1267_s18] sm:$0xff]  ;;  %v542_v4 = vld [vmem:[%s1267_s18 + $0x18] sm:$0xff] }
 0x130   : > { %995 = vset.pattern.permute.xlu1 %v1123_v0  ;;  %994 = vset.pattern.permute.xlu0 %v1123_v0  ;;  %v532_v7 = vld [vmem:[#allocation2 + $0x8] sm:$0xff]  ;;  %v543_v13 = vld [vmem:[%s1267_s18 + $0x20] sm:$0xff]  ;;  %v546_v17 = vld [vmem:[%s1267_s18 + $0x38] sm:$0xff] }
 0x131   : > { %v531_v63 = vld [vmem:[#allocation2] sm:$0xff]  ;;  %v540_v8 = vld [vmem:[%s1267_s18 + $0x8] sm:$0xff]  ;;  %v545_v19 = vld [vmem:[%s1267_s18 + $0x30] sm:$0xff] }
 0x132   : > { %v547_v5 = vadd.f32 %v539_v2, %v531_v63  ;;  %v536_v9 = vld [vmem:[#allocation2 + $0x28] sm:$0xff]  ;;  %v548_v10 = vadd.f32 %v540_v8, %v532_v7  ;;  %v535_v12 = vld [vmem:[#allocation2 + $0x20] sm:$0xff]  ;;  %v565_v30 = vld [vmem:[%s1272_s23 + $0x10] sm:$0xff] }
 0x133   : > { %v534_v3 = vld [vmem:[#allocation2 + $0x18] sm:$0xff]  ;;  %v544_v11 = vld [vmem:[%s1267_s18 + $0x28] sm:$0xff]  ;;  %v551_v15 = vadd.f32 %v543_v13, %v535_v12  ;;  %v563_v31 = vld [vmem:[%s1272_s23] sm:$0xff] }
 0x134   : > { %v550_v6 = vadd.f32 %v542_v4, %v534_v3  ;;  %v552_v14 = vadd.f32 %v544_v11, %v536_v9  ;;  %v538_v16 = vld [vmem:[#allocation2 + $0x38] sm:$0xff]  ;;  %v564_v37 = vld [vmem:[%s1272_s23 + $0x8] sm:$0xff]  ;;  %v567_v43 = vld [vmem:[%s1272_s23 + $0x20] sm:$0xff] }
 0x135   : > { %v533_v61 = vld [vmem:[#allocation2 + $0x10] sm:$0xff]  ;;  %v554_v20 = vadd.f32 %v546_v17, %v538_v16  ;;  %v566_v36 = vld [vmem:[%s1272_s23 + $0x18] sm:$0xff]  ;;  %v568_v42 = vld [vmem:[%s1272_s23 + $0x28] sm:$0xff] }
 0x136   : > { %v549_v1 = vadd.f32 %v541_v62, %v533_v61  ;;  %v537_v18 = vld [vmem:[#allocation2 + $0x30] sm:$0xff]  ;;  %v570_v48 = vld [vmem:[%s1272_s23 + $0x38] sm:$0xff] }
 0x137   : > { %v553_v21 = vadd.f32 %v545_v19, %v537_v18  ;;  %v569_v49 = vld [vmem:[%s1272_s23 + $0x30] sm:$0xff] }
 0x138   : > { %996 = vtanh.f32 %v549_v1 }
 0x139   : > { %998 = vtanh.f32 %v547_v5 }
 0x13a   : > { %1000 = vtanh.f32 %v550_v6 }
 0x13b   : > { %1002 = vtanh.f32 %v548_v10 }
 0x13c   : > { %1004 = vtanh.f32 %v552_v14 }
 0x13d   : > { %1006 = vtanh.f32 %v551_v15 }
 0x13e   : > { %1008 = vtanh.f32 %v554_v20 }
 0x13f   : > { %1010 = vtanh.f32 %v553_v21 }
 0x145   : > { %v997_v22 = vpop.eup %996 }
 0x146   : > { %v999_v23 = vpop.eup %998  ;;  %583 = vperm.xlu1 %995, %v997_v22  }
 0x147   : > { %v1001_v24 = vpop.eup %1000  ;;  %573 = vperm.xlu0 %994, %v999_v23  }
 0x148   : > { %v1003_v25 = vpop.eup %1002 }
 0x149   : > { %v1005_v26 = vpop.eup %1004 }
 0x14a   : > { %588 = vperm.xlu1 %995, %v1001_v24   ;;  %v1007_v27 = vpop.eup %1006 }
 0x14b   : > { %578 = vperm.xlu0 %994, %v1003_v25   ;;  %v1009_v28 = vpop.eup %1008 }
 0x14c   : > { %v1011_v29 = vpop.eup %1010 }
 0x14e   : > { %598 = vperm.xlu1 %995, %v1005_v26  }
 0x14f   : > { %593 = vperm.xlu0 %994, %v1007_v27  }
 0x152   : > { %608 = vperm.xlu1 %995, %v1009_v28  }
 0x153   : > { %603 = vperm.xlu0 %994, %v1011_v29  }
 0x1c1   : > { %v584_v32 = vpop.permute.xlu1 %583 }
 0x1c2   : > { %v613_v33 = vmul.f32 %v584_v32, %v565_v30  ;;  %v574_v34 = vpop.permute.xlu0 %573 }
 0x1c3   : > { %v611_v35 = vmul.f32 %v574_v34, %v563_v31 }
 0x1c4   : > { %621 = vst [vmem:[%s1276_s12 + $0x10] sm:$0xff] %v613_v33 }
 0x1c5   : > { %619 = vst [vmem:[%s1276_s12] sm:$0xff] %v611_v35  ;;  %v589_v38 = vpop.permute.xlu1 %588 }
 0x1c6   : > { %v614_v39 = vmul.f32 %v589_v38, %v566_v36  ;;  %v579_v40 = vpop.permute.xlu0 %578 }
 0x1c7   : > { %v612_v41 = vmul.f32 %v579_v40, %v564_v37 }
 0x1c8   : > { %622 = vst [vmem:[%s1276_s12 + $0x18] sm:$0xff] %v614_v39 }
 0x1c9   : > { %620 = vst [vmem:[%s1276_s12 + $0x8] sm:$0xff] %v612_v41  ;;  %v599_v44 = vpop.permute.xlu1 %598 }
 0x1ca   : > { %v616_v45 = vmul.f32 %v599_v44, %v568_v42  ;;  %v594_v46 = vpop.permute.xlu0 %593 }
 0x1cb   : > { %v615_v47 = vmul.f32 %v594_v46, %v567_v43 }
 0x1cc   : > { %624 = vst [vmem:[%s1276_s12 + $0x28] sm:$0xff] %v616_v45 }
 0x1cd   : > { %623 = vst [vmem:[%s1276_s12 + $0x20] sm:$0xff] %v615_v47  ;;  %v609_v50 = vpop.permute.xlu1 %608 }
 0x1ce   : > { %v618_v51 = vmul.f32 %v609_v50, %v570_v48  ;;  %v604_v52 = vpop.permute.xlu0 %603 }
 0x1cf   : > { %v617_v53 = vmul.f32 %v604_v52, %v569_v49 }
 0x1d0   : > { %626 = vst [vmem:[%s1276_s12 + $0x38] sm:$0xff] %v618_v51 }
 0x1d1   : > { %625 = vst [vmem:[%s1276_s12 + $0x30] sm:$0xff] %v617_v53 }
 0x1d2 PF: > { %s783_s0 = sshll.u32 %s1108_s21, 10  ;;  %s641_s28 = sshll.u32 %s1276_s12, 4  ;;  %s1339_s28 = int_to_ptr.vmem [resolvable:$true] %s641_s28 }
 0x1d3   : > { %s1336_s27 = scalar_lea.hbm %s1404_s4, %s783_s0  ;;  %s1420_s23 = sand.u32 1, %s1088_s16  }
 0x1d4   : > { %s1343_s13 = scalar_lea.sflag [#allocation5], %s1420_s23  ;;  %s1012_s14 = scalar_lea.vmem %s1339_s28, 1024 }
 0x1d5   : > { %p1013_p8 = scmp.ne.s32.totalorder %s1339_s28, %s1012_s14  ;;  %s1124_s21 = smov [#allocation4]  }
 0x1d6   : > { %s1016_s25 = sshll.u32 %s1124_s21, 4  ;;  %s1017_s25 = int_to_ptr.vmem [resolvable:$false] %s1016_s25 }
 0x1d7   : > { %p1014_p9 = pnand %p1013_p8, %p1224_p7  ;;  %s1018_s26 = scalar_lea.vmem %s1017_s25, 2048 }
 0x1d8   : > { %p1019_p11 = scmp.lt.s32.totalorder %s1339_s28, %s1017_s25  ;;  %p1020_p13 = scmp.lt.s32.totalorder %s1018_s26, %s1012_s14 }
 0x1d9   : > { %p1015_p10 = pneg %p1014_p9 }
 0x1da   : > { %p1021_p0 = por %p1020_p13, %p1019_p11 }
 0x1dc   : > { %p1022_p1 = pnand %p1021_p0, %p1015_p10 }
 0x1de   : > { %1025 = shalt.err (!%p1022_p1)
}
 0x1df   : > { %s1026_s12 = scalar_lea.hbm %s1336_s27, 1024  ;;  %s1030_s9 = scalar_lea.hbm %s1404_s4, 4096 }
 0x1e0   : > { %p1027_p2 = scmp.ne.s32.totalorder %s1336_s27, %s1026_s12  ;;  %p1031_p5 = scmp.lt.s32.totalorder %s1336_s27, %s1404_s4 }
 0x1e1   : > { %p1032_p6 = scmp.lt.s32.totalorder %s1030_s9, %s1026_s12 }
 0x1e2   : > { %p1028_p3 = pnand %p1027_p2, %p1224_p7 }
 0x1e3   : > { %p1033_p8 = por %p1032_p6, %p1031_p5 }
 0x1e4   : > { %p1029_p4 = pneg %p1028_p3 }
 0x1e6   : > { %p1034_p9 = pnand %p1033_p8, %p1029_p4 }
 0x1e8   : > { %1037 = shalt.err (!%p1034_p9)
}
 0x1e9   : > { %s1125_s18 = smov 128   ;;  %s1126_s5 = smov 8  }
 0x1ea   : > { %903 = dma.vmem_to_hbm [thread:$0]  (%p1224_p7), %s1339_s28, 1024, %s1336_s27, %s1343_s13, %s1125_s18, %s1125_s18, %s1126_s5  }
 0x1eb PF: > { %p909_p10 = scmp.ge.s32.totalorder %s1120_s24, 2  ;;  %s656_s0 = sand.u32 1, %s1084_s15  }
 0x1ec   : > { %s657_s20 = scalar_lea.sflag [#allocation5], %s656_s0 }
 0x1ed   : > { %p906_p11 = pnand %p909_p10, %p1232_p12 }
 0x1ef   : > { %p907_p13 = pneg %p906_p11 }
 0x1f1   : > { %1079 = dma.done.wait (%p907_p13), %s657_s20, 1024  }
 0x1f2   : > { %1081 = vsyncadd (%p907_p13), %s657_s20, 4294966272  ;;  %s17_s24 = sadd.s32 1, %s1120_s24   ;;  %s1421_s7 = sld [smem:[#allocation11_spill]] }
 0x1f3   : > { %p14_p0 = scmp.ge.s32.totalorder %s17_s24, 10   ;;  %s1422_s20 = sld [smem:[#allocation7_spill]] }
 0x1f4   : > { %s1423_s21 = sld [smem:[#allocation8_spill]]  ;;  %s1426_s15 = smov %s1088_s16 }
 0x1f5   : > { %s1424_s22 = sld [smem:[#allocation9_spill]]  ;;  %s1427_s16 = smov %s1092_s17 }
 0x1f6   : > { %s1425_s23 = sld [smem:[#allocation10_spill]]  ;;  %s1428_s17 = smov %s1237_s11 }
 0x1f7   : > { %s1429_s18 = smov %s1100_s19  ;;  %16 = sbr.rel (!%p14_p0) target bundleno = 8 (0x8), region = 134 }
 0x1f8   : > { %s1430_s19 = smov %s1421_s7 }
 0x1fc   :  { %662 = vsyncpa [#allocation5], 1 }
 0x1fd   :  { %664 = vsyncpa [#allocation5 + $0x1], 1 }

</bundles_post_ra>
